<compile_context>
chip_gen: v7x
topology: tpu7x:2x2x1
jax: 0.10.0
libtpu: 0.0.40
codegen_flags: <defaults>
</compile_context>

<pallas_src>
import math
import functools

import numpy as np
import jax
import jax.numpy as jnp
from jax import lax
from jax.experimental import pallas as pl
from jax.experimental.pallas import tpu as pltpu


def _vit_attn_kernel(x_ref, wqkv_ref, bqkv_ref, wd_ref, bd_ref, o_ref, qkv_ref,
                     *, num_heads, head_size, q_tile):
    D = num_heads * head_size

    # Project the whole sequence once per batch element (first q-tile only);
    # result persists in VMEM scratch across the q-tile ("arbitrary") axis.
    @pl.when(pl.program_id(1) == 0)
    def _project():
        xb = x_ref[0]                                               # (S, D) bf16
        qkv = lax.dot_general(xb, wqkv_ref[...],
                              dimension_numbers=(((1,), (0,)), ((), ())),
                              preferred_element_type=jnp.float32)   # (S, 3D) f32
        qkv = qkv + bqkv_ref[0]
        qkv_ref[...] = qkv.astype(qkv_ref.dtype)                    # store bf16

    q_start = pl.multiple_of(pl.program_id(1) * q_tile, q_tile)
    scale = 1.0 / math.sqrt(head_size)

    acc = jnp.zeros((q_tile, D), jnp.float32)
    for h in range(num_heads):
        c0 = h * head_size
        q_h = qkv_ref[pl.ds(q_start, q_tile), c0:c0 + head_size]      # (TQ, hd)
        k_h = qkv_ref[:, D + c0:D + c0 + head_size]                   # (S, hd)
        v_h = qkv_ref[:, 2 * D + c0:2 * D + c0 + head_size]           # (S, hd)

        # Scores: contract the head dim of q and k directly (no explicit k.T).
        s = lax.dot_general(q_h, k_h,
                            dimension_numbers=(((1,), (1,)), ((), ())),
                            preferred_element_type=jnp.float32) * scale  # (TQ, S)
        s = s - jnp.max(s, axis=-1, keepdims=True)                    # stable softmax
        p = jnp.exp(s)
        p = p * pl.reciprocal(jnp.sum(p, axis=-1, keepdims=True), approx=True)

        ctx_h = jnp.dot(p.astype(jnp.bfloat16), v_h,
                        preferred_element_type=jnp.float32)           # (TQ, hd)

        # Fused output projection: avoids concatenating heads entirely.
        acc = acc + jnp.dot(ctx_h.astype(jnp.bfloat16),
                            wd_ref[c0:c0 + head_size, :],
                            preferred_element_type=jnp.float32)       # (TQ, D)

    o_ref[0] = (acc + bd_ref[0]).astype(o_ref.dtype)


def vit_self_attention(x, w_qkv, b_qkv, w_dense, b_dense, *, num_heads):
    B, S, D = x.shape
    hd = D // num_heads
    out_dtype = x.dtype

    # One-time column permutation (outside the kernel, folded into weights):
    # torch per-head interleaved [q_h|k_h|v_h] -> head-major [Q_all|K_all|V_all].
    perm = np.concatenate([
        np.arange(h * 3 * hd + part * hd, h * 3 * hd + (part + 1) * hd)
        for part in range(3) for h in range(num_heads)
    ])
    w_qkv_p = jnp.asarray(w_qkv)[:, perm].astype(jnp.bfloat16)
    b_qkv_p = jnp.asarray(b_qkv)[perm].astype(jnp.float32).reshape(1, -1)
    w_dense_b = jnp.asarray(w_dense).astype(jnp.bfloat16)
    b_dense_f = jnp.asarray(b_dense).astype(jnp.float32).reshape(1, -1)
    x_b = x.astype(jnp.bfloat16)

    # Query tiling: bounds the (TQ, S) score matrix in VMEM at large S.
    TQ = 128 if S % 128 == 0 else S
    NQ = S // TQ

    kernel = functools.partial(_vit_attn_kernel, num_heads=num_heads,
                               head_size=hd, q_tile=TQ)
    return pl.pallas_call(
        kernel,
        out_shape=jax.ShapeDtypeStruct((B, S, D), out_dtype),
        grid_spec=pltpu.PrefetchScalarGridSpec(
            num_scalar_prefetch=0,
            grid=(B, NQ),
            in_specs=[
                pl.BlockSpec((1, S, D), lambda b, q: (b, 0, 0)),    # x (full seq)
                pl.BlockSpec((D, 3 * D), lambda b, q: (0, 0)),      # W_qkv (bf16)
                pl.BlockSpec((1, 3 * D), lambda b, q: (0, 0)),      # b_qkv (f32)
                pl.BlockSpec((D, D), lambda b, q: (0, 0)),          # W_dense (bf16)
                pl.BlockSpec((1, D), lambda b, q: (0, 0)),          # b_dense (f32)
            ],
            out_specs=pl.BlockSpec((1, TQ, D), lambda b, q: (b, q, 0)),
            scratch_shapes=[pltpu.VMEM((S, 3 * D), jnp.bfloat16)],  # projected QKV
        ),
        compiler_params=pltpu.CompilerParams(
            dimension_semantics=("parallel", "arbitrary"),
            vmem_limit_bytes=48 * 1024 * 1024,
        ),
    )(x_b, w_qkv_p, b_qkv_p, w_dense_b, b_dense_f)


def vit_self_attention_ref(x, w_qkv, b_qkv, w_dense, b_dense, *, num_heads):
    """Pure-JAX f32 reference replicating the PyTorch forward exactly."""
    B, S, D = x.shape
    hd = D // num_heads
    qkv = x @ w_qkv + b_qkv                                     # (B, S, 3D)
    qkv = qkv.reshape(B, S, num_heads, 3 * hd).transpose(0, 2, 1, 3)
    q, k, v = qkv[..., :hd], qkv[..., hd:2 * hd], qkv[..., 2 * hd:]
    s = jnp.einsum('bhqd,bhkd->bhqk', q, k) / math.sqrt(hd)
    p = jax.nn.softmax(s, axis=-1)
    ctx = jnp.einsum('bhqk,bhkd->bhqd', p, v)
    ctx = ctx.transpose(0, 2, 1, 3).reshape(B, S, D)
    return ctx @ w_dense + b_dense


if __name__ == "__main__":
    B, S, D, H = 2, 8, 32, 4   # batch, seq, hidden dim, heads
    key = jax.random.PRNGKey(0)
    kx, kw1, kb1, kw2, kb2 = jax.random.split(key, 5)

    x = jax.random.normal(kx, (B, S, D), dtype=jnp.float32)
    # Deterministic synthetic parameters (shapes from Linear(D, 3D) / Linear(D, D)).
    w_qkv = jax.random.normal(kw1, (D, 3 * D), dtype=jnp.float32) * (1.0 / math.sqrt(D))
    b_qkv = jax.random.normal(kb1, (3 * D,), dtype=jnp.float32) * 0.02
    w_dense = jax.random.normal(kw2, (D, D), dtype=jnp.float32) * (1.0 / math.sqrt(D))
    b_dense = jax.random.normal(kb2, (D,), dtype=jnp.float32) * 0.02

    out = vit_self_attention(x, w_qkv, b_qkv, w_dense, b_dense, num_heads=H)
    out = jax.block_until_ready(out)

    ref = vit_self_attention_ref(x, w_qkv, b_qkv, w_dense, b_dense, num_heads=H)
    assert out.shape == (B, S, D)
    # Tolerance relaxed for bf16 matmul operands + approximate reciprocal
    # (f32 accumulation / f32 softmax; reference is pure f32).
    assert jnp.allclose(out, ref, atol=8e-2, rtol=8e-2), "mismatch vs reference"
    print("KERNEL_OK")
</pallas_src>

<mosaic_0001>
module attributes {stable_mosaic.version = 11 : i64} {
  func.func @_vit_attn_kernel(%arg0: i32, %arg1: i32, %arg2: memref<1x8x32xbf16, #tpu.memory_space<vmem>>, %arg3: memref<32x96xbf16, #tpu.memory_space<vmem>>, %arg4: memref<1x96xf32, #tpu.memory_space<vmem>>, %arg5: memref<32x32xbf16, #tpu.memory_space<vmem>>, %arg6: memref<1x32xf32, #tpu.memory_space<vmem>>, %arg7: memref<1x8x32xf32, #tpu.memory_space<vmem>>, %arg8: memref<8x96xbf16, #tpu.memory_space<vmem>>) attributes {dimension_semantics = [#tpu.dimension_semantics<parallel>, #tpu.dimension_semantics<arbitrary>], iteration_bounds = array<i64: 2, 1>, scalar_prefetch = 0 : i64, scratch_operands = 1 : i64, tpu.core_type = #tpu.core_type<tc>, window_params = [{transform_indices = @transform_0, window_bounds = array<i64: 1, 8, 32>}, {pipeline_mode = #tpu.pipeline_mode<synchronous>, transform_indices = @transform_1, window_bounds = array<i64: 32, 96>}, {pipeline_mode = #tpu.pipeline_mode<synchronous>, transform_indices = @transform_2, window_bounds = array<i64: 1, 96>}, {pipeline_mode = #tpu.pipeline_mode<synchronous>, transform_indices = @transform_3, window_bounds = array<i64: 32, 32>}, {pipeline_mode = #tpu.pipeline_mode<synchronous>, transform_indices = @transform_4, window_bounds = array<i64: 1, 32>}, {transform_indices = @transform_5, window_bounds = array<i64: 1, 8, 32>}]} {
    %c0_i32 = arith.constant 0 : i32
    %0 = arith.cmpi eq, %arg1, %c0_i32 : i32
    %1 = arith.extui %0 : i1 to i32
    %c0_i32_0 = arith.constant 0 : i32
    %2 = arith.cmpi ne, %1, %c0_i32_0 : i32
    scf.if %2 {
      %c0_46 = arith.constant 0 : index
      %c0_47 = arith.constant 0 : index
      %c0_48 = arith.constant 0 : index
      %106 = vector.load %arg2[%c0_46, %c0_47, %c0_48] : memref<1x8x32xbf16, #tpu.memory_space<vmem>>, vector<1x8x32xbf16>
      %107 = vector.shape_cast %106 : vector<1x8x32xbf16> to vector<8x32xbf16>
      %c0_49 = arith.constant 0 : index
      %c0_50 = arith.constant 0 : index
      %108 = vector.load %arg3[%c0_49, %c0_50] : memref<32x96xbf16, #tpu.memory_space<vmem>>, vector<32x96xbf16>
      %cst_51 = arith.constant dense<0.000000e+00> : vector<8x96xf32>
      %109 = tpu.matmul %107, %108, %cst_51 {dimension_numbers = #tpu.dot_dimension_numbers<[1], [0], [0], [1], [0, 0, 1, 1], [], []>} : vector<8x32xbf16>, vector<32x96xbf16>, vector<8x96xf32> -> vector<8x96xf32>
      %c0_52 = arith.constant 0 : index
      %c0_53 = arith.constant 0 : index
      %110 = vector.load %arg4[%c0_52, %c0_53] : memref<1x96xf32, #tpu.memory_space<vmem>>, vector<1x96xf32>
      %111 = vector.shape_cast %110 : vector<1x96xf32> to vector<96xf32>
      %112 = vector.shape_cast %111 : vector<96xf32> to vector<1x96xf32>
      %113 = vector.broadcast %112 : vector<1x96xf32> to vector<8x96xf32>
      %114 = arith.addf %109, %113 : vector<8x96xf32>
      %115 = arith.truncf %114 : vector<8x96xf32> to vector<8x96xbf16>
      %c0_54 = arith.constant 0 : index
      %c0_55 = arith.constant 0 : index
      %116 = vector.load %arg8[%c0_54, %c0_55] : memref<8x96xbf16, #tpu.memory_space<vmem>>, vector<8x96xbf16>
      tpu.vector_store %arg8[%c0_54, %c0_55], %115 {strides = array<i32>} : memref<8x96xbf16, #tpu.memory_space<vmem>>, vector<8x96xbf16>,
    } else {
    }
    %c8_i32 = arith.constant 8 : i32
    %3 = arith.muli %arg1, %c8_i32 : i32
    %4 = tpu.assume_multiple %3, 8 : i32
    %cst = arith.constant 0.000000e+00 : f32
    %5 = vector.broadcast %cst : f32 to vector<8x32xf32>
    %6 = arith.index_cast %4 : i32 to index
    %c0 = arith.constant 0 : index
    %7 = vector.load %arg8[%6, %c0] : memref<8x96xbf16, #tpu.memory_space<vmem>>, vector<8x8xbf16>
    %c0_1 = arith.constant 0 : index
    %c32 = arith.constant 32 : index
    %8 = vector.load %arg8[%c0_1, %c32] : memref<8x96xbf16, #tpu.memory_space<vmem>>, vector<8x8xbf16>
    %c0_2 = arith.constant 0 : index
    %c64 = arith.constant 64 : index
    %9 = vector.load %arg8[%c0_2, %c64] : memref<8x96xbf16, #tpu.memory_space<vmem>>, vector<8x8xbf16>
    %cst_3 = arith.constant dense<0.000000e+00> : vector<8x8xf32>
    %10 = tpu.matmul %7, %8, %cst_3 {dimension_numbers = #tpu.dot_dimension_numbers<[1], [1], [0], [0], [0, 0, 1, 0], [], []>} : vector<8x8xbf16>, vector<8x8xbf16>, vector<8x8xf32> -> vector<8x8xf32>
    %cst_4 = arith.constant 0.353553385 : f32
    %11 = vector.broadcast %cst_4 : f32 to vector<8x8xf32>
    %12 = arith.mulf %10, %11 : vector<8x8xf32>
    %cst_5 = arith.constant dense<0xFF800000> : vector<8xf32>
    %13 = vector.multi_reduction <maximumf>, %12, %cst_5 [1] : vector<8x8xf32> to vector<8xf32>
    %14 = vector.shape_cast %13 : vector<8xf32> to vector<8x1xf32>
    %15 = vector.broadcast %14 : vector<8x1xf32> to vector<8x8xf32>
    %16 = arith.subf %12, %15 : vector<8x8xf32>
    %17 = math.exp %16 : vector<8x8xf32>
    %cst_6 = arith.constant dense<0.000000e+00> : vector<8xf32>
    %18 = vector.multi_reduction <add>, %17, %cst_6 [1] : vector<8x8xf32> to vector<8xf32>
    %19 = vector.shape_cast %18 : vector<8xf32> to vector<8x1xf32>
    %20 = tpu.reciprocal %19 {approx = true} : vector<8x1xf32> -> vector<8x1xf32>
    %21 = vector.broadcast %20 : vector<8x1xf32> to vector<8x8xf32>
    %22 = arith.mulf %17, %21 : vector<8x8xf32>
    %23 = arith.truncf %22 : vector<8x8xf32> to vector<8x8xbf16>
    %cst_7 = arith.constant dense<0.000000e+00> : vector<8x8xf32>
    %24 = tpu.matmul %23, %9, %cst_7 {dimension_numbers = #tpu.dot_dimension_numbers<[1], [0], [0], [1], [0, 0, 1, 1], [], []>} : vector<8x8xbf16>, vector<8x8xbf16>, vector<8x8xf32> -> vector<8x8xf32>
    %25 = arith.truncf %24 : vector<8x8xf32> to vector<8x8xbf16>
    %c0_8 = arith.constant 0 : index
    %c0_9 = arith.constant 0 : index
    %26 = vector.load %arg5[%c0_8, %c0_9] : memref<32x32xbf16, #tpu.memory_space<vmem>>, vector<8x32xbf16>
    %cst_10 = arith.constant dense<0.000000e+00> : vector<8x32xf32>
    %27 = tpu.matmul %25, %26, %cst_10 {dimension_numbers = #tpu.dot_dimension_numbers<[1], [0], [0], [1], [0, 0, 1, 1], [], []>} : vector<8x8xbf16>, vector<8x32xbf16>, vector<8x32xf32> -> vector<8x32xf32>
    %28 = arith.addf %5, %27 : vector<8x32xf32>
    %29 = arith.index_cast %4 : i32 to index
    %c8 = arith.constant 8 : index
    %30 = vector.load %arg8[%29, %c8] : memref<8x96xbf16, #tpu.memory_space<vmem>>, vector<8x8xbf16>
    %c0_11 = arith.constant 0 : index
    %c40 = arith.constant 40 : index
    %31 = vector.load %arg8[%c0_11, %c40] : memref<8x96xbf16, #tpu.memory_space<vmem>>, vector<8x8xbf16>
    %c0_12 = arith.constant 0 : index
    %c72 = arith.constant 72 : index
    %32 = vector.load %arg8[%c0_12, %c72] : memref<8x96xbf16, #tpu.memory_space<vmem>>, vector<8x8xbf16>
    %cst_13 = arith.constant dense<0.000000e+00> : vector<8x8xf32>
    %33 = tpu.matmul %30, %31, %cst_13 {dimension_numbers = #tpu.dot_dimension_numbers<[1], [1], [0], [0], [0, 0, 1, 0], [], []>} : vector<8x8xbf16>, vector<8x8xbf16>, vector<8x8xf32> -> vector<8x8xf32>
    %cst_14 = arith.constant 0.353553385 : f32
    %34 = vector.broadcast %cst_14 : f32 to vector<8x8xf32>
    %35 = arith.mulf %33, %34 : vector<8x8xf32>
    %cst_15 = arith.constant dense<0xFF800000> : vector<8xf32>
    %36 = vector.multi_reduction <maximumf>, %35, %cst_15 [1] : vector<8x8xf32> to vector<8xf32>
    %37 = vector.shape_cast %36 : vector<8xf32> to vector<8x1xf32>
    %38 = vector.broadcast %37 : vector<8x1xf32> to vector<8x8xf32>
    %39 = arith.subf %35, %38 : vector<8x8xf32>
    %40 = math.exp %39 : vector<8x8xf32>
    %cst_16 = arith.constant dense<0.000000e+00> : vector<8xf32>
    %41 = vector.multi_reduction <add>, %40, %cst_16 [1] : vector<8x8xf32> to vector<8xf32>
    %42 = vector.shape_cast %41 : vector<8xf32> to vector<8x1xf32>
    %43 = tpu.reciprocal %42 {approx = true} : vector<8x1xf32> -> vector<8x1xf32>
    %44 = vector.broadcast %43 : vector<8x1xf32> to vector<8x8xf32>
    %45 = arith.mulf %40, %44 : vector<8x8xf32>
    %46 = arith.truncf %45 : vector<8x8xf32> to vector<8x8xbf16>
    %cst_17 = arith.constant dense<0.000000e+00> : vector<8x8xf32>
    %47 = tpu.matmul %46, %32, %cst_17 {dimension_numbers = #tpu.dot_dimension_numbers<[1], [0], [0], [1], [0, 0, 1, 1], [], []>} : vector<8x8xbf16>, vector<8x8xbf16>, vector<8x8xf32> -> vector<8x8xf32>
    %48 = arith.truncf %47 : vector<8x8xf32> to vector<8x8xbf16>
    %c8_18 = arith.constant 8 : index
    %c0_19 = arith.constant 0 : index
    %49 = vector.load %arg5[%c8_18, %c0_19] : memref<32x32xbf16, #tpu.memory_space<vmem>>, vector<8x32xbf16>
    %cst_20 = arith.constant dense<0.000000e+00> : vector<8x32xf32>
    %50 = tpu.matmul %48, %49, %cst_20 {dimension_numbers = #tpu.dot_dimension_numbers<[1], [0], [0], [1], [0, 0, 1, 1], [], []>} : vector<8x8xbf16>, vector<8x32xbf16>, vector<8x32xf32> -> vector<8x32xf32>
    %51 = arith.addf %28, %50 : vector<8x32xf32>
    %52 = arith.index_cast %4 : i32 to index
    %c16 = arith.constant 16 : index
    %53 = vector.load %arg8[%52, %c16] : memref<8x96xbf16, #tpu.memory_space<vmem>>, vector<8x8xbf16>
    %c0_21 = arith.constant 0 : index
    %c48 = arith.constant 48 : index
    %54 = vector.load %arg8[%c0_21, %c48] : memref<8x96xbf16, #tpu.memory_space<vmem>>, vector<8x8xbf16>
    %c0_22 = arith.constant 0 : index
    %c80 = arith.constant 80 : index
    %55 = vector.load %arg8[%c0_22, %c80] : memref<8x96xbf16, #tpu.memory_space<vmem>>, vector<8x8xbf16>
    %cst_23 = arith.constant dense<0.000000e+00> : vector<8x8xf32>
    %56 = tpu.matmul %53, %54, %cst_23 {dimension_numbers = #tpu.dot_dimension_numbers<[1], [1], [0], [0], [0, 0, 1, 0], [], []>} : vector<8x8xbf16>, vector<8x8xbf16>, vector<8x8xf32> -> vector<8x8xf32>
    %cst_24 = arith.constant 0.353553385 : f32
    %57 = vector.broadcast %cst_24 : f32 to vector<8x8xf32>
    %58 = arith.mulf %56, %57 : vector<8x8xf32>
    %cst_25 = arith.constant dense<0xFF800000> : vector<8xf32>
    %59 = vector.multi_reduction <maximumf>, %58, %cst_25 [1] : vector<8x8xf32> to vector<8xf32>
    %60 = vector.shape_cast %59 : vector<8xf32> to vector<8x1xf32>
    %61 = vector.broadcast %60 : vector<8x1xf32> to vector<8x8xf32>
    %62 = arith.subf %58, %61 : vector<8x8xf32>
    %63 = math.exp %62 : vector<8x8xf32>
    %cst_26 = arith.constant dense<0.000000e+00> : vector<8xf32>
    %64 = vector.multi_reduction <add>, %63, %cst_26 [1] : vector<8x8xf32> to vector<8xf32>
    %65 = vector.shape_cast %64 : vector<8xf32> to vector<8x1xf32>
    %66 = tpu.reciprocal %65 {approx = true} : vector<8x1xf32> -> vector<8x1xf32>
    %67 = vector.broadcast %66 : vector<8x1xf32> to vector<8x8xf32>
    %68 = arith.mulf %63, %67 : vector<8x8xf32>
    %69 = arith.truncf %68 : vector<8x8xf32> to vector<8x8xbf16>
    %cst_27 = arith.constant dense<0.000000e+00> : vector<8x8xf32>
    %70 = tpu.matmul %69, %55, %cst_27 {dimension_numbers = #tpu.dot_dimension_numbers<[1], [0], [0], [1], [0, 0, 1, 1], [], []>} : vector<8x8xbf16>, vector<8x8xbf16>, vector<8x8xf32> -> vector<8x8xf32>
    %71 = arith.truncf %70 : vector<8x8xf32> to vector<8x8xbf16>
    %c16_28 = arith.constant 16 : index
    %c0_29 = arith.constant 0 : index
    %72 = vector.load %arg5[%c16_28, %c0_29] : memref<32x32xbf16, #tpu.memory_space<vmem>>, vector<8x32xbf16>
    %cst_30 = arith.constant dense<0.000000e+00> : vector<8x32xf32>
    %73 = tpu.matmul %71, %72, %cst_30 {dimension_numbers = #tpu.dot_dimension_numbers<[1], [0], [0], [1], [0, 0, 1, 1], [], []>} : vector<8x8xbf16>, vector<8x32xbf16>, vector<8x32xf32> -> vector<8x32xf32>
    %74 = arith.addf %51, %73 : vector<8x32xf32>
    %75 = arith.index_cast %4 : i32 to index
    %c24 = arith.constant 24 : index
    %76 = vector.load %arg8[%75, %c24] : memref<8x96xbf16, #tpu.memory_space<vmem>>, vector<8x8xbf16>
    %c0_31 = arith.constant 0 : index
    %c56 = arith.constant 56 : index
    %77 = vector.load %arg8[%c0_31, %c56] : memref<8x96xbf16, #tpu.memory_space<vmem>>, vector<8x8xbf16>
    %c0_32 = arith.constant 0 : index
    %c88 = arith.constant 88 : index
    %78 = vector.load %arg8[%c0_32, %c88] : memref<8x96xbf16, #tpu.memory_space<vmem>>, vector<8x8xbf16>
    %cst_33 = arith.constant dense<0.000000e+00> : vector<8x8xf32>
    %79 = tpu.matmul %76, %77, %cst_33 {dimension_numbers = #tpu.dot_dimension_numbers<[1], [1], [0], [0], [0, 0, 1, 0], [], []>} : vector<8x8xbf16>, vector<8x8xbf16>, vector<8x8xf32> -> vector<8x8xf32>
    %cst_34 = arith.constant 0.353553385 : f32
    %80 = vector.broadcast %cst_34 : f32 to vector<8x8xf32>
    %81 = arith.mulf %79, %80 : vector<8x8xf32>
    %cst_35 = arith.constant dense<0xFF800000> : vector<8xf32>
    %82 = vector.multi_reduction <maximumf>, %81, %cst_35 [1] : vector<8x8xf32> to vector<8xf32>
    %83 = vector.shape_cast %82 : vector<8xf32> to vector<8x1xf32>
    %84 = vector.broadcast %83 : vector<8x1xf32> to vector<8x8xf32>
    %85 = arith.subf %81, %84 : vector<8x8xf32>
    %86 = math.exp %85 : vector<8x8xf32>
    %cst_36 = arith.constant dense<0.000000e+00> : vector<8xf32>
    %87 = vector.multi_reduction <add>, %86, %cst_36 [1] : vector<8x8xf32> to vector<8xf32>
    %88 = vector.shape_cast %87 : vector<8xf32> to vector<8x1xf32>
    %89 = tpu.reciprocal %88 {approx = true} : vector<8x1xf32> -> vector<8x1xf32>
    %90 = vector.broadcast %89 : vector<8x1xf32> to vector<8x8xf32>
    %91 = arith.mulf %86, %90 : vector<8x8xf32>
    %92 = arith.truncf %91 : vector<8x8xf32> to vector<8x8xbf16>
    %cst_37 = arith.constant dense<0.000000e+00> : vector<8x8xf32>
    %93 = tpu.matmul %92, %78, %cst_37 {dimension_numbers = #tpu.dot_dimension_numbers<[1], [0], [0], [1], [0, 0, 1, 1], [], []>} : vector<8x8xbf16>, vector<8x8xbf16>, vector<8x8xf32> -> vector<8x8xf32>
    %94 = arith.truncf %93 : vector<8x8xf32> to vector<8x8xbf16>
    %c24_38 = arith.constant 24 : index
    %c0_39 = arith.constant 0 : index
    %95 = vector.load %arg5[%c24_38, %c0_39] : memref<32x32xbf16, #tpu.memory_space<vmem>>, vector<8x32xbf16>
    %cst_40 = arith.constant dense<0.000000e+00> : vector<8x32xf32>
    %96 = tpu.matmul %94, %95, %cst_40 {dimension_numbers = #tpu.dot_dimension_numbers<[1], [0], [0], [1], [0, 0, 1, 1], [], []>} : vector<8x8xbf16>, vector<8x32xbf16>, vector<8x32xf32> -> vector<8x32xf32>
    %97 = arith.addf %74, %96 : vector<8x32xf32>
    %c0_41 = arith.constant 0 : index
    %c0_42 = arith.constant 0 : index
    %98 = vector.load %arg6[%c0_41, %c0_42] : memref<1x32xf32, #tpu.memory_space<vmem>>, vector<1x32xf32>
    %99 = vector.shape_cast %98 : vector<1x32xf32> to vector<32xf32>
    %100 = vector.shape_cast %99 : vector<32xf32> to vector<1x32xf32>
    %101 = vector.broadcast %100 : vector<1x32xf32> to vector<8x32xf32>
    %102 = arith.addf %97, %101 : vector<8x32xf32>
    %c0_43 = arith.constant 0 : index
    %c0_44 = arith.constant 0 : index
    %c0_45 = arith.constant 0 : index
    %103 = vector.load %arg7[%c0_43, %c0_44, %c0_45] : memref<1x8x32xf32, #tpu.memory_space<vmem>>, vector<1x8x32xf32>
    %104 = vector.shape_cast %103 : vector<1x8x32xf32> to vector<8x32xf32>
    %105 = vector.shape_cast %102 : vector<8x32xf32> to vector<1x8x32xf32>
    tpu.vector_store %arg7[%c0_43, %c0_44, %c0_45], %105 {strides = array<i32>} : memref<1x8x32xf32, #tpu.memory_space<vmem>>, vector<1x8x32xf32>,
    return
  }
  func.func @transform_0(%arg0: i32, %arg1: i32) -> (i32, i32, i32) {
    %c0_i32 = arith.constant 0 : i32
    %c0_i32_0 = arith.constant 0 : i32
    %c0_i32_1 = arith.constant 0 : i32
    return %arg0, %c0_i32, %c0_i32_0 : i32, i32, i32
  }
  func.func @transform_1(%arg0: i32, %arg1: i32) -> (i32, i32) {
    %c0_i32 = arith.constant 0 : i32
    %c0_i32_0 = arith.constant 0 : i32
    %c0_i32_1 = arith.constant 0 : i32
    return %c0_i32, %c0_i32_0 : i32, i32
  }
  func.func @transform_2(%arg0: i32, %arg1: i32) -> (i32, i32) {
    %c0_i32 = arith.constant 0 : i32
    %c0_i32_0 = arith.constant 0 : i32
    %c0_i32_1 = arith.constant 0 : i32
    return %c0_i32, %c0_i32_0 : i32, i32
  }
  func.func @transform_3(%arg0: i32, %arg1: i32) -> (i32, i32) {
    %c0_i32 = arith.constant 0 : i32
    %c0_i32_0 = arith.constant 0 : i32
    %c0_i32_1 = arith.constant 0 : i32
    return %c0_i32, %c0_i32_0 : i32, i32
  }
  func.func @transform_4(%arg0: i32, %arg1: i32) -> (i32, i32) {
    %c0_i32 = arith.constant 0 : i32
    %c0_i32_0 = arith.constant 0 : i32
    %c0_i32_1 = arith.constant 0 : i32
    return %c0_i32, %c0_i32_0 : i32, i32
  }
  func.func @transform_5(%arg0: i32, %arg1: i32) -> (i32, i32, i32) {
    %c0_i32 = arith.constant 0 : i32
    %c0_i32_0 = arith.constant 0 : i32
    return %arg0, %arg1, %c0_i32 : i32, i32, i32
  }
}

</mosaic_0001>

<bundles_post_ra>
// kernel: tpu_custom_call.1
= control target key start
LH: loop header
LB: loop body
LE: loop exit
PB: predicated region body
PF: predicated region fallthrough
CT: control target
= control target key end

     0   :  { %10 = vsyncpa [#allocation4], 0  ;;  %s1968_s0 = inlined_call_operand.hbm [shape: bf16[2,8,32], index: 0, kind: input, shape index: {}]   ;;  %s1969_s1 = inlined_call_operand.hbm [shape: bf16[32,96], index: 1, kind: input, shape index: {}]   ;;  %s1970_s2 = inlined_call_operand.vmem [shape: f32[1,96], index: 2, kind: input, shape index: {}]   ;;  %s1971_s3 = inlined_call_operand.hbm [shape: bf16[32,32], index: 3, kind: input, shape index: {}]   ;;  %s1972_s4 = inlined_call_operand.vmem [shape: f32[1,32], index: 4, kind: input, shape index: {}]   ;;  %s1973_s5 = inlined_call_operand.hbm [shape: f32[2,8,32], index: 5, kind: output, shape index: {}]  }
   0x1   :  { %12 = vsyncpa [#allocation4 + $0x1], 0 }
   0x2   :  { %13 = vsyncpa [#allocation7], 0 }
   0x3   :  { %14 = vsyncpa [#allocation5], 0 }
   0x4   :  { %16 = vsyncpa [#allocation5 + $0x1], 0  ;;  %s1619_s18 = smov 0   ;;  %s1621_s19 = smov 0  }
   0x5   :  { %s1623_s20 = smov 0   ;;  %s1625_s21 = smov 0  }
   0x6   :  { %s1627_s22 = smov 0   ;;  %s1629_s23 = smov 0  }
   0x7 LB: > { %s1135_s24 = sadd.s32 4294967295, %s1568_s23   ;;  %s1136_s25 = sadd.s32 4294967294, %s1568_s23   ;;  %s1568_s23 = sphi %s1629_s23, %s22_s23   ;;  %s1564_s22 = sphi %s1627_s22, %s1995_s22   ;;  %s1560_s21 = sphi %s1625_s21, %s1994_s21   ;;  %s1556_s20 = sphi %s1623_s20, %s1993_s20   ;;  %s1552_s19 = sphi %s1621_s19, %s1992_s19   ;;  %s1548_s18 = sphi %s1619_s18, %s1991_s18  }
   0x8   : > { %p54_p0 = scmp.ne.s32.totalorder %s1552_s19, %s1548_s18  ;;  %p1653_p1 = scmp.eq.s32.totalorder %s1135_s24, 0 }
   0x9   : > { %p1657_p2 = scmp.eq.s32.totalorder %s1135_s24, 1  ;;  %p170_p3 = scmp.eq.s32.totalorder %s1136_s25, 1 }
   0xa   : > { %s1978_s26 = scalar_select %p1653_p1, 1, 0 }
   0xb   : > { %p1663_p4 = por %p1653_p1, %p54_p0  ;;  %p1137_p5 = scmp.ge.s32.totalorder %s1568_s23, 1 }
   0xc   : > { %p1668_p6 = por %p170_p3, %p54_p0  ;;  %p177_p7 = scmp.lt.s32.totalorder %s1568_s23, 3 }
   0xd   : > { %s1980_s28 = scalar_select %p1663_p4, 1, 0 }
   0xe   : > { %s1981_s29 = scalar_select %p1668_p6, 1, 0 }
   0xf   : > { %p1673_p8 = pnand %p1137_p5, %p177_p7  ;;  %s1570_s6 = smov [#allocation6]  }
  0x10   : > { %s189_s7 = sshll.u32 %s1570_s6, 4  ;;  %s1571_s9 = smov [#allocation8]   ;;  %s1677_s7 = int_to_ptr.vmem [resolvable:$true] %s189_s7 }
  0x11   : > { %p1290_p9 = pneg %p1673_p8  ;;  %s205_s10 = sshll.u32 %s1571_s9, 4  ;;  %s1688_s10 = int_to_ptr.vmem [resolvable:$true] %s205_s10 }
  0x12   : > { %s1396_s13 = scalar_lea.hbm %s1969_s1, 256 }
  0x13   : > { %p1684_p11 = pnand %p1290_p9, %p1653_p1  ;;  %p1397_p12 = scmp.ne.s32.totalorder %s1969_s1, %s1396_s13 }
  0x14   : > { %p1403_p5 = scmp.lt.u32.totalorder %s1396_s13, %s1969_s1 }
  0x15   : > { %p1398_p13 = pneg %p1684_p11 }
  0x17   : > { %p1399_p0 = pnand %p1398_p13, %p1397_p12 }
  0x19   : > { %p1400_p3 = pneg %p1399_p0 }
  0x1b   : > { %p1405_p7 = pnand %p1403_p5, %p1400_p3 }
  0x1d   : > { %1408 = shalt.err (!%p1405_p7)
}
  0x1e   : > { %s1409_s24 = scalar_lea.vmem %s1677_s7, 256  ;;  %p1417_p1 = scmp.lt.s32.totalorder %s1677_s7, %s1677_s7 }
  0x1f   : > { %p1410_p9 = scmp.ne.s32.totalorder %s1677_s7, %s1409_s24  ;;  %p1418_p12 = scmp.lt.s32.totalorder %s1409_s24, %s1409_s24 }
  0x21   : > { %p1412_p10 = pnand %p1410_p9, %p1398_p13  ;;  %p1419_p0 = por %p1418_p12, %p1417_p1 }
  0x23   : > { %p1413_p6 = pneg %p1412_p10 }
  0x25   : > { %p1420_p4 = pnand %p1419_p0, %p1413_p6 }
  0x27   : > { %1423 = shalt.err (!%p1420_p4)
}
  0x28   : > { %s1572_s25 = smov 64   ;;  %s1573_s6 = smov 4  }
  0x29   : > { %1293 = dma.hbm_to_vmem [thread:$0]  (!%p1684_p11), %s1969_s1, 256, %s1677_s7, [#allocation7], %s1572_s25, %s1572_s25, %s1573_s6  }
  0x2a   : > { %s1424_s14 = scalar_lea.hbm %s1971_s3, 256 }
  0x2b   : > { %p1425_p1 = scmp.ne.s32.totalorder %s1971_s3, %s1424_s14  ;;  %p1431_p10 = scmp.lt.u32.totalorder %s1424_s14, %s1971_s3 }
  0x2d   : > { %p1427_p4 = pnand %p1425_p1, %p1398_p13 }
  0x2f   : > { %p1428_p6 = pneg %p1427_p4 }
  0x31   : > { %p1433_p3 = pnand %p1431_p10, %p1428_p6 }
  0x33   : > { %1436 = shalt.err (!%p1433_p3)
}
  0x34   : > { %s1437_s7 = scalar_lea.vmem %s1688_s10, 256  ;;  %p1445_p12 = scmp.lt.s32.totalorder %s1688_s10, %s1688_s10 }
  0x35   : > { %p1438_p5 = scmp.ne.s32.totalorder %s1688_s10, %s1437_s7  ;;  %p1446_p0 = scmp.lt.s32.totalorder %s1437_s7, %s1437_s7 }
  0x37   : > { %p1440_p7 = pnand %p1438_p5, %p1398_p13  ;;  %p1447_p1 = por %p1446_p0, %p1445_p12 }
  0x39   : > { %p1441_p9 = pneg %p1440_p7 }
  0x3b   : > { %p1448_p4 = pnand %p1447_p1, %p1441_p9 }
  0x3d   : > { %1451 = shalt.err (!%p1448_p4)
}
  0x3e   : > { %1296 = dma.hbm_to_vmem [thread:$0]  (!%p1684_p11), %s1971_s3, 256, %s1688_s10, [#allocation7], %s1572_s25, %s1572_s25, %s1573_s6  }
  0x3f   : > { %s34_s12 = sadd.s32 1, %s1564_s22  ;;  %s41_s13 = sadd.s32 1, %s1556_s20 }
  0x40   : > { %p36_p13 = scmp.ge.s32.totalorder %s34_s12, 2  ;;  %p48_p6 = scmp.ne.s32.totalorder %s1556_s20, %s1552_s19 }
  0x41   : > { %p49_p10 = scmp.eq.s32.totalorder %s1568_s23, 0  ;;  %p1307_p3 = scmp.lt.s32.totalorder %s1568_s23, 2 }
  0x42   : > { %s1997_s12 = smov (%p36_p13, %s34_s12), 0  ;;  %p1752_p7 = por %p1657_p2, %p48_p6 }
  0x43   : > { %p50_p5 = por %p49_p10, %p48_p6  ;;  %s38_s14 = ssub.s32 %s1564_s22, %s1997_s12 }
  0x44   : > { %s1984_s8 = scalar_select %p1752_p7, 1, 0 }
  0x45   : > { %s222_s15 = sand.u32 1, %s1556_s20   ;;  %p39_p9 = scmp.eq.s32.totalorder %s38_s14, 0 }
  0x46   : > { %s1141_s10 = sshll.u32 %s222_s15, 2  ;;  %s1142_s25 = sshll.u32 %s1564_s22, 6 }
  0x47   : > { %s1761_s6 = scalar_select %p39_p9, %s1556_s20, %s41_s13  }
  0x48   : > { %s1766_s24 = scalar_lea.hbm %s1968_s0, %s1142_s25  ;;  %s226_s27 = scalar_lea.vmem [#allocation3], %s1141_s10 }
  0x49   : > { %s233_s7 = sshll.u32 %s226_s27, 4  ;;  %p1770_p2 = pnand %p1307_p3, %p50_p5  ;;  %s1774_s7 = int_to_ptr.vmem [resolvable:$true] %s233_s7 }
  0x4a   : > { %s223_s11 = scalar_lea.sflag [#allocation4], %s222_s15  ;;  %s1452_s13 = scalar_lea.hbm %s1766_s24, 64 }
  0x4b   : > { %p1453_p11 = scmp.ne.s32.totalorder %s1766_s24, %s1452_s13  ;;  %p1454_p12 = pneg %p1770_p2 }
  0x4c   : > { %s1457_s25 = scalar_lea.hbm %s1968_s0, 128  ;;  %p1458_p4 = scmp.lt.u32.totalorder %s1766_s24, %s1968_s0 }
  0x4d   : > { %p1455_p0 = pnand %p1454_p12, %p1453_p11  ;;  %p1459_p13 = scmp.lt.u32.totalorder %s1457_s25, %s1452_s13 }
  0x4e   : > { %p1461_p10 = scmp.lt.u32.totalorder %s1452_s13, %s1766_s24 }
  0x4f   : > { %p1456_p1 = pneg %p1455_p0  ;;  %p1460_p6 = por %p1459_p13, %p1458_p4 }
  0x51   : > { %p1462_p3 = por %p1461_p10, %p1460_p6 }
  0x53   : > { %p1463_p5 = pnand %p1462_p3, %p1456_p1 }
  0x55   : > { %1466 = shalt.err (!%p1463_p5)
}
  0x56   : > { %s1467_s15 = scalar_lea.vmem %s1774_s7, 64  ;;  %s1574_s27 = smov [#allocation3]  }
  0x57   : > { %p1468_p9 = scmp.ne.s32.totalorder %s1774_s7, %s1467_s15  ;;  %s1472_s14 = sshll.u32 %s1574_s27, 4  ;;  %s1473_s14 = int_to_ptr.vmem [resolvable:$false] %s1472_s14 }
  0x58   : > { %s1474_s10 = scalar_lea.vmem %s1473_s14, 128  ;;  %p1475_p7 = scmp.lt.s32.totalorder %s1774_s7, %s1473_s14 }
  0x59   : > { %p1470_p11 = pnand %p1468_p9, %p1454_p12  ;;  %p1476_p4 = scmp.lt.s32.totalorder %s1474_s10, %s1467_s15 }
  0x5b   : > { %p1471_p0 = pneg %p1470_p11  ;;  %p1477_p13 = por %p1476_p4, %p1475_p7 }
  0x5d   : > { %p1478_p6 = pnand %p1477_p13, %p1471_p0 }
  0x5f   : > { %1481 = shalt.err (!%p1478_p6)
}
  0x60   : > { %1300 = dma.hbm_to_vmem [thread:$0]  (!%p1770_p2), %s1766_s24, 64, %s1774_s7, %s223_s11  }
  0x61   : > { %242 = sbr.rel (%p1673_p8) target bundleno = 2737 (0xab1), region = 40  ;;  %s1804_s13 = sand.u32 (!%p1673_p8), 1, %s1552_s19  }
  0x62   : > { %s1144_s25 = sshll.u32 (!%p1673_p8), %s1804_s13, 2  ;;  %s245_s16 = scalar_lea.sflag (!%p1673_p8), [#allocation4], %s1804_s13 }
  0x63   : > { %s248_s17 = scalar_lea.vmem (!%p1673_p8), [#allocation3], %s1144_s25  ;;  %p1986_p7 = scmp.ne.s32.totalorder (!%p1673_p8), %s1980_s28, 0 }
  0x68   : > { %1535 = dma.done.wait (%p1986_p7), %s245_s16, 64  }
  0x69   : > { %1537 = vsyncadd (%p1986_p7), %s245_s16, 4294967232  ;;  %p1987_p12 = scmp.ne.s32.totalorder %s1978_s26, 0 }
  0x6b   : > { %1539 = dma.done.wait (%p1987_p12), [#allocation7], 512  }
  0x6c   : > { %1541 = vsyncadd (%p1987_p12), [#allocation7], 4294966784  ;;  %v1575_v0 = vmov 0.0   ;;  %vm1576_vm0 = vmmov 0   ;;  %v1376_v1 = vld [vmem:[#allocation6] sm:$0xff]   ;;  %v1377_v2 = vld [vmem:[#allocation6 + $0x8] sm:$0xff]  }
  0x6d   : > { %1198 = vmatprep.subr.bf16.mxu0 %v1575_v0  ;;  %1202 = vmatprep.mubr.msk.bf16.mxu0 %vm1576_vm0, %v1575_v0  ;;  %v288_v3 = vld [vmem:[%s248_s17] sm:$0xf]  ;;  %vm312_vm1 = vcmask 261120   ;;  %v1148_v4 = vld [vmem:[%s1970_s2] ss:$0 sm:$0xff]  ;;  %vm357_vm2 = vcmask 781312  }
  0x6e   : > { %1206 = vmatprep.subr.bf16.mxu1 %v1575_v0  ;;  %1208 = vmatprep.mubr.msk.bf16.mxu1 %vm1576_vm0, %v1575_v0  ;;  %s1577_s30 = smov 96   ;;  %s1578_s24 = smov 120   ;;  %vm371_vm3 = vcmask 64512   ;;  %vm436_vm4 = vcmask 1043456   ;;  %v481_v53 = vld [vmem:[#allocation8] sm:$0xf] }
  0x6f   : > { %1199 = vmatpush3.bf16.msra.mxu0 %v1376_v1  ;;  %s1579_s7 = smov 88   ;;  %s1580_s9 = smov 64   ;;  %v648_v54 = vsel %vm436_vm4, %v481_v53, 0  ;;  %v597_v55 = vld [vmem:[#allocation8 + $0x4] sm:$0xf] }
  0x70   : > { %1200 = vmatprep.subr.bf16.mxu0 %v1575_v0  ;;  %s1581_s11 = smov 56   ;;  %s1582_s15 = smov 112   ;;  %v602_v56 = vsel %vm436_vm4, %v597_v55, 0 }
  0x71   : > { %s1583_s27 = smov 80   ;;  %s1584_s14 = smov 72  }
  0x72   : > { %s1585_s10 = smov 104   ;;  %s1586_s25 = smov 48  }
  0x73   : > { %1201 = vmatpush3.bf16.msra.mxu0 %v1377_v2  ;;  %s1587_s16 = smov 40   ;;  %s1147_s17 = sshll.u32 %s1804_s13, 3 }
  0x74   : > { %1212 = vmatprep.subr.bf16.mxu0 %v1575_v0  ;;  %p1988_p2 = scmp.ne.s32.totalorder %s1984_s8, 0 }
  0x76   : > { %1203 = vmatmul.mubr.msk.bf16.vlgmr.msra.gmra.mrb[0].mxu0 %vm312_vm1, %v288_v3 }
  0x77   : > { %1214 = vmatprep.mubr.msk.bf16.mxu0 %vm1576_vm0, %v1575_v0 }
 0x149   : > { %v350_v5 = vpop.f32.mrb[0].mxu0 }
 0x14a   : > { %v351_v6 = vadd.f32 %v1148_v4, %v350_v5  ;;  %v1204_v7 = vpop.f32.mrb[1].mxu0 }
 0x14b   : > { %v353_v8 = vpop.f32.mrb[2].mxu0 }
 0x14c   : > { %v356_v9 = vpack.c.bf16 %v351_v6, %v351_v6  ;;  %v1205_v10 = vpop.f32.mrb[3].mxu0 }
 0x14e   : > { %358 = vst.msk [vmem:[#allocation2] sm:$0xf] %vm357_vm2, %v356_v9 }
 0x155   : > { %v1830_v11 = vld [vmem:[#allocation2] ss:$0 sps:$4 sm:$0xff]  }
 0x156   : > { %v364_v12 = vld [vmem:[#allocation2] sm:$0xf]  ;;  %369 = vrot.lane.b32.xlu0 %v1830_v11, %s1577_s30  ;;  %s1168_s30 = sshll.u32 %s1560_s21, 7  ;;  %s1021_s21 = scalar_lea.sflag [#allocation5], %s1804_s13 }
 0x157   : > { %v1832_v13 = vcombine.low %v364_v12, %v364_v12 }
 0x159   : > { %485 = vrot.lane.b32.xlu1 %v1832_v13, %s1578_s24  ;;  %s282_s24 = scalar_lea.vmem [#allocation9], %s1147_s17 }
 0x15a   : > { %487 = vrot.lane.b32.xlu0 %v1830_v11, %s1579_s7  ;;  %s1035_s7 = sshll.u32 %s282_s24, 4  ;;  %s1920_s7 = int_to_ptr.vmem [resolvable:$true] %s1035_s7 }
 0x1c8   : > { %v370_v14 = vpop.permute.xlu0 %369 }
 0x1c9   : > { %v376_v15 = vsel %vm371_vm3, %v370_v14, 0 }
 0x1ca   : > { %1207 = vmatpush3.bf16.xpose.msra.mxu1 %v376_v15 }
 0x1cb   : > { %1218 = vmatprep.subr.bf16.mxu1 %v1575_v0  ;;  %v486_v18 = vpop.permute.xlu1 %485 }
 0x1cc   : > { %v488_v16 = vpop.permute.xlu0 %487 }
 0x1cd   : > { %v493_v17 = vsel %vm371_vm3, %v488_v16, 0 }
 0x1d1   : > { %1209 = vmatmul.mubr.msk.bf16.vlgmr.msra.gmra.mrb[0].mxu1 %vm371_vm3, %v364_v12 }
 0x1d2   : > { %1219 = vmatpush3.bf16.xpose.msra.mxu1 %v493_v17  ;;  %1220 = vmatprep.mubr.msk.bf16.mxu1 %vm1576_vm0, %v1575_v0 }
 0x1d3   : > { %1230 = vmatprep.subr.bf16.mxu1 %v1575_v0 }
 0x1d9   : > { %1221 = vmatmul.mubr.msk.bf16.vlgmr.msra.gmra.mrb[4].mxu1 %vm371_vm3, %v486_v18 }
 0x1da   : > { %1232 = vmatprep.mubr.msk.bf16.mxu1 %vm1576_vm0, %v1575_v0  ;;  %1231 = vmatpush3.bf16.msra.mxu1 %v602_v56  ;;  %v962_v56 = vld [vmem:[#allocation8 + $0xc] sm:$0xf] }
 0x1db   : > { %1242 = vmatprep.subr.bf16.mxu1 %v1575_v0 }
 0x2a4   : > { %v412_v19 = vpop.f32.mrb[0].mxu1 }
 0x2a5   : > { %v418_v20 = vmul.f32 0.35355338, %v412_v19  ;;  %v1210_v21 = vpop.f32.mrb[1].mxu1 }
 0x2a6   : > { %v415_v22 = vpop.f32.mrb[2].mxu1 }
 0x2a7   : > { %v1211_v23 = vpop.f32.mrb[3].mxu1  ;;  %v419_v24 = vsel %vm371_vm3, %v418_v20, -inf }
 0x2a8   : > { %420 = vmax.xlane.f32.xlu1 %v419_v24 }
 0x2ac   : > { %v529_v25 = vpop.f32.mrb[4].mxu1 }
 0x2ad   : > { %v535_v26 = vmul.f32 0.35355338, %v529_v25  ;;  %v1222_v27 = vpop.f32.mrb[5].mxu1 }
 0x2ae   : > { %v532_v28 = vpop.f32.mrb[6].mxu1 }
 0x2af   : > { %v1223_v29 = vpop.f32.mrb[7].mxu1  ;;  %v536_v30 = vsel %vm371_vm3, %v535_v26, -inf }
 0x2b0   : > { %537 = vmax.xlane.f32.xlu0 %v536_v30 }
 0x335   : > { %v421_v31 = vpop.xlane.xlu1 %420 }
 0x336   : > { %v422_v32 = vsub.f32 %v418_v20, %v421_v31 }
 0x338   : > { %v423_v33 = vmul.f32 1.442695, %v422_v32 }
 0x33a   : > { %1380 = vpow2.f32 %v423_v33 }
 0x33d   : > { %v538_v34 = vpop.xlane.xlu0 %537 }
 0x33e   : > { %v539_v35 = vsub.f32 %v535_v26, %v538_v34 }
 0x340   : > { %v540_v36 = vmul.f32 1.442695, %v539_v35 }
 0x342   : > { %1382 = vpow2.f32 %v540_v36 }
 0x344   : > { %v1381_v37 = vpop.eup %1380 }
 0x345   : > { %v425_v38 = vsel %vm371_vm3, %v1381_v37, 0.0 }
 0x346   : > { %426 = vadd.xlane.f32.xlu0 %v425_v38 }
 0x34c   : > { %v1383_v39 = vpop.eup %1382 }
 0x34d   : > { %v542_v40 = vsel %vm371_vm3, %v1383_v39, 0.0 }
 0x34e   : > { %543 = vadd.xlane.f32.xlu1 %v542_v40 }
 0x35c   : > { %431 = vrot.lane.b32.xlu0 %v1830_v11, %s1580_s9 }
 0x35f   : > { %548 = vrot.lane.b32.xlu1 %v1830_v11, %s1581_s11 }
 0x360   : > { %690 = vrot.lane.b32.xlu0 %v1832_v13, %s1582_s15  ;;  %s1918_s15 = scalar_lea.hbm %s1973_s5, %s1168_s30 }
 0x363   : > { %692 = vrot.lane.b32.xlu1 %v1830_v11, %s1583_s27  ;;  %s1482_s27 = scalar_lea.vmem %s1920_s7, 128 }
 0x364   : > { %p1483_p8 = scmp.ne.s32.totalorder %s1920_s7, %s1482_s27 }
 0x366   : > { %p1484_p1 = pnand %p1483_p8, %p1988_p2 }
 0x368   : > { %p1485_p10 = pneg %p1484_p1 }
 0x3d3   : > { %v427_v41 = vpop.xlane.xlu0 %426 }
 0x3d4   : > { %1384 = vrcp.f32 %v427_v41 }
 0x3d7   : > { %v432_v42 = vpop.permute.xlu0 %431 }
 0x3d8   : > { %v438_v43 = vsel %vm436_vm4, %v432_v42, 0 }
 0x3d9   : > { %1213 = vmatpush3.bf16.msra.mxu0 %v438_v43 }
 0x3da   : > { %1224 = vmatprep.subr.bf16.mxu0 %v1575_v0 }
 0x3db   : > { %v544_v44 = vpop.xlane.xlu1 %543  ;;  %v691_v6 = vpop.permute.xlu0 %690 }
 0x3dc   : > { %1386 = vrcp.f32 %v544_v44 }
 0x3de   : > { %v1385_v45 = vpop.eup %1384 }
 0x3df   : > { %v429_v46 = vmul.f32 %v1385_v45, %v1381_v37  ;;  %v549_v47 = vpop.permute.xlu1 %548  ;;  %v802_v37 = vld [vmem:[#allocation8 + $0x8] sm:$0xf] }
 0x3e0   : > { %v554_v49 = vsel %vm436_vm4, %v549_v47, 0  ;;  %v807_v38 = vsel %vm436_vm4, %v802_v37, 0 }
 0x3e1   : > { %v430_v48 = vpack.c.bf16 %v429_v46, %v429_v46 }
 0x3e3   : > { %1215 = vmatmul.mubr.msk.bf16.vlgmr.msra.gmra.mrb[4].mxu0 %vm371_vm3, %v430_v48  ;;  %v693_v62 = vpop.permute.xlu1 %692 }
 0x3e4   : > { %1225 = vmatpush3.bf16.msra.mxu0 %v554_v49  ;;  %1226 = vmatprep.mubr.msk.bf16.mxu0 %vm1576_vm0, %v1575_v0  ;;  %v698_v4 = vsel %vm371_vm3, %v693_v62, 0 }
 0x3e5   : > { %1236 = vmatprep.subr.bf16.mxu0 %v1575_v0 }
 0x3e6   : > { %v1387_v50 = vpop.eup %1386 }
 0x3e7   : > { %v546_v51 = vmul.f32 %v1387_v50, %v1383_v39 }
 0x3e9   : > { %v547_v52 = vpack.c.bf16 %v546_v51, %v546_v51 }
 0x3eb   : > { %1227 = vmatmul.mubr.msk.bf16.vlgmr.msra.gmra.mrb[8].mxu0 %vm371_vm3, %v547_v52 }
 0x3ec   : > { %1238 = vmatprep.mubr.msk.bf16.mxu0 %vm1576_vm0, %v1575_v0  ;;  %1237 = vmatpush3.bf16.msra.mxu0 %v648_v54 }
 0x3ed   : > { %1248 = vmatprep.subr.bf16.mxu0 %v1575_v0 }
 0x4b6   : > { %v474_v57 = vpop.f32.mrb[4].mxu0 }
 0x4b7   : > { %v480_v58 = vpack.c.bf16 %v474_v57, %v474_v57  ;;  %v1216_v59 = vpop.f32.mrb[5].mxu0  ;;  %v967_v57 = vsel %vm436_vm4, %v962_v56, 0 }
 0x4b8   : > { %v477_v60 = vpop.f32.mrb[6].mxu0 }
 0x4b9   : > { %v1217_v61 = vpop.f32.mrb[7].mxu0  ;;  %1239 = vmatmul.mubr.msk.bf16.vlgmr.msra.gmra.mrb[12].mxu0 %vm371_vm3, %v480_v58 }
 0x4ba   : > { %1250 = vmatprep.mubr.msk.bf16.mxu0 %vm1576_vm0, %v1575_v0 }
 0x4be   : > { %v590_v63 = vpop.f32.mrb[8].mxu0 }
 0x4bf   : > { %v596_v1 = vpack.c.bf16 %v590_v63, %v590_v63  ;;  %v1228_v2 = vpop.f32.mrb[9].mxu0 }
 0x4c0   : > { %v593_v3 = vpop.f32.mrb[10].mxu0 }
 0x4c1   : > { %v1229_v5 = vpop.f32.mrb[11].mxu0  ;;  %1233 = vmatmul.mubr.msk.bf16.vlgmr.msra.gmra.mrb[8].mxu1 %vm371_vm3, %v596_v1 }
 0x4c2   : > { %1243 = vmatpush3.bf16.xpose.msra.mxu1 %v698_v4  ;;  %1244 = vmatprep.mubr.msk.bf16.mxu1 %vm1576_vm0, %v1575_v0 }
 0x4c3   : > { %1254 = vmatprep.subr.bf16.mxu1 %v1575_v0 }
 0x4c9   : > { %1245 = vmatmul.mubr.msk.bf16.vlgmr.msra.gmra.mrb[12].mxu1 %vm371_vm3, %v691_v6 }
 0x4ca   : > { %1256 = vmatprep.mubr.msk.bf16.mxu1 %vm1576_vm0, %v1575_v0  ;;  %1255 = vmatpush3.bf16.msra.mxu1 %v807_v38 }
 0x4cb   : > { %1266 = vmatprep.subr.bf16.mxu1 %v1575_v0 }
 0x58c   : > { %v684_v7 = vpop.f32.mrb[12].mxu0 }
 0x58d   : > { %v1240_v8 = vpop.f32.mrb[13].mxu0 }
 0x58e   : > { %v687_v9 = vpop.f32.mrb[14].mxu0 }
 0x58f   : > { %v1241_v10 = vpop.f32.mrb[15].mxu0  ;;  %v1166_v9 = vld [vmem:[%s1972_s4] ss:$0 sm:$0xff] }
 0x594   : > { %v638_v12 = vpop.f32.mrb[8].mxu1 }
 0x595   : > { %v1880_v14 = vadd.f32 %v684_v7, %v638_v12  ;;  %v1234_v15 = vpop.f32.mrb[9].mxu1 }
 0x596   : > { %v641_v16 = vpop.f32.mrb[10].mxu1 }
 0x597   : > { %v1235_v17 = vpop.f32.mrb[11].mxu1 }
 0x59c   : > { %v734_v18 = vpop.f32.mrb[12].mxu1 }
 0x59d   : > { %v740_v19 = vmul.f32 0.35355338, %v734_v18  ;;  %v1246_v20 = vpop.f32.mrb[13].mxu1 }
 0x59e   : > { %v737_v21 = vpop.f32.mrb[14].mxu1 }
 0x59f   : > { %v1247_v22 = vpop.f32.mrb[15].mxu1  ;;  %v741_v23 = vsel %vm371_vm3, %v740_v19, -inf }
 0x5a0   : > { %742 = vmax.xlane.f32.xlu1 %v741_v23 }
 0x5b1   : > { %852 = vrot.lane.b32.xlu1 %v1830_v11, %s1584_s14  ;;  %s1588_s14 = smov [#allocation9]  }
 0x5b5   : > { %850 = vrot.lane.b32.xlu1 %v1832_v13, %s1585_s10  ;;  %s1486_s10 = sshll.u32 %s1588_s14, 4  ;;  %s1487_s10 = int_to_ptr.vmem [resolvable:$false] %s1486_s10 }
 0x5b6   : > { %p1489_p3 = scmp.lt.s32.totalorder %s1920_s7, %s1487_s10 }
 0x62d   : > { %v743_v24 = vpop.xlane.xlu1 %742 }
 0x62e   : > { %v744_v25 = vsub.f32 %v740_v19, %v743_v24 }
 0x630   : > { %v745_v26 = vmul.f32 1.442695, %v744_v25 }
 0x631   : > { %v853_v33 = vpop.permute.xlu1 %852 }
 0x632   : > { %1388 = vpow2.f32 %v745_v26  ;;  %v858_v35 = vsel %vm371_vm3, %v853_v33, 0 }
 0x635   : > { %v851_v36 = vpop.permute.xlu1 %850 }
 0x63c   : > { %v1389_v27 = vpop.eup %1388 }
 0x63d   : > { %v747_v28 = vsel %vm371_vm3, %v1389_v27, 0.0 }
 0x63e   : > { %748 = vadd.xlane.f32.xlu0 %v747_v28 }
 0x654   : > { %753 = vrot.lane.b32.xlu0 %v1830_v11, %s1586_s25  ;;  %s1488_s25 = scalar_lea.vmem %s1487_s10, 256 }
 0x655   : > { %p1490_p5 = scmp.lt.s32.totalorder %s1488_s25, %s1482_s27 }
 0x657   : > { %p1491_p9 = por %p1490_p5, %p1489_p3 }
 0x659   : > { %p1492_p11 = pnand %p1491_p9, %p1485_p10 }
 0x6cb   : > { %v749_v29 = vpop.xlane.xlu0 %748 }
 0x6cc   : > { %1390 = vrcp.f32 %v749_v29 }
 0x6cf   : > { %v754_v30 = vpop.permute.xlu0 %753 }
 0x6d0   : > { %v759_v31 = vsel %vm436_vm4, %v754_v30, 0 }
 0x6d1   : > { %1249 = vmatpush3.bf16.msra.mxu0 %v759_v31 }
 0x6d2   : > { %1260 = vmatprep.subr.bf16.mxu0 %v1575_v0 }
 0x6d6   : > { %v1391_v13 = vpop.eup %1390 }
 0x6d7   : > { %v751_v32 = vmul.f32 %v1391_v13, %v1389_v27 }
 0x6d9   : > { %v752_v34 = vpack.c.bf16 %v751_v32, %v751_v32 }
 0x6db   : > { %1251 = vmatmul.mubr.msk.bf16.vlgmr.msra.gmra.mrb[16].mxu0 %vm371_vm3, %v752_v34 }
 0x6dc   : > { %1261 = vmatpush3.bf16.xpose.msra.mxu0 %v858_v35  ;;  %1262 = vmatprep.mubr.msk.bf16.mxu0 %vm1576_vm0, %v1575_v0 }
 0x6dd   : > { %1272 = vmatprep.subr.bf16.mxu0 %v1575_v0 }
 0x6e3   : > { %1263 = vmatmul.mubr.msk.bf16.vlgmr.msra.gmra.mrb[20].mxu0 %vm371_vm3, %v851_v36 }
 0x6e4   : > { %1274 = vmatprep.mubr.msk.bf16.mxu0 %vm1576_vm0, %v1575_v0  ;;  %1273 = vmatpush3.bf16.msra.mxu0 %v967_v57 }
 0x7ae   : > { %v795_v39 = vpop.f32.mrb[16].mxu0 }
 0x7af   : > { %v801_v40 = vpack.c.bf16 %v795_v39, %v795_v39  ;;  %v1252_v41 = vpop.f32.mrb[17].mxu0 }
 0x7b0   : > { %v798_v42 = vpop.f32.mrb[18].mxu0 }
 0x7b1   : > { %v1253_v43 = vpop.f32.mrb[19].mxu0  ;;  %1257 = vmatmul.mubr.msk.bf16.vlgmr.msra.gmra.mrb[16].mxu1 %vm371_vm3, %v801_v40 }
 0x7b2   : > { %1268 = vmatprep.mubr.msk.bf16.mxu1 %vm1576_vm0, %v1575_v0 }
 0x7b6   : > { %v894_v44 = vpop.f32.mrb[20].mxu0 }
 0x7b7   : > { %v900_v45 = vmul.f32 0.35355338, %v894_v44  ;;  %v1264_v46 = vpop.f32.mrb[21].mxu0 }
 0x7b8   : > { %v897_v47 = vpop.f32.mrb[22].mxu0 }
 0x7b9   : > { %v1265_v48 = vpop.f32.mrb[23].mxu0  ;;  %v901_v49 = vsel %vm371_vm3, %v900_v45, -inf }
 0x7ba   : > { %902 = vmax.xlane.f32.xlu0 %v901_v49 }
 0x7d0   : > { %913 = vrot.lane.b32.xlu0 %v1830_v11, %s1587_s16 }
 0x847   : > { %v903_v50 = vpop.xlane.xlu0 %902 }
 0x848   : > { %v904_v51 = vsub.f32 %v900_v45, %v903_v50 }
 0x84a   : > { %v905_v52 = vmul.f32 1.442695, %v904_v51 }
 0x84b   : > { %v914_v53 = vpop.permute.xlu0 %913 }
 0x84c   : > { %1392 = vpow2.f32 %v905_v52  ;;  %v919_v54 = vsel %vm436_vm4, %v914_v53, 0 }
 0x84d   : > { %1267 = vmatpush3.bf16.msra.mxu1 %v919_v54 }
 0x856   : > { %v1393_v0 = vpop.eup %1392 }
 0x857   : > { %v907_v55 = vsel %vm371_vm3, %v1393_v0, 0.0 }
 0x858   : > { %908 = vadd.xlane.f32.xlu1 %v907_v55 }
 0x884   : > { %v843_v58 = vpop.f32.mrb[16].mxu1 }
 0x885   : > { %v849_v59 = vadd.f32 %v843_v58, %v1880_v14  ;;  %v1258_v11 = vpop.f32.mrb[17].mxu1 }
 0x886   : > { %v846_v60 = vpop.f32.mrb[18].mxu1 }
 0x887   : > { %v1259_v61 = vpop.f32.mrb[19].mxu1 }
 0x8e5   : > { %v909_v62 = vpop.xlane.xlu1 %908 }
 0x8e6   : > { %1394 = vrcp.f32 %v909_v62 }
 0x8f0   : > { %v1395_v63 = vpop.eup %1394 }
 0x8f1   : > { %v911_v1 = vmul.f32 %v1395_v63, %v1393_v0 }
 0x8f3   : > { %v912_v2 = vpack.c.bf16 %v911_v1, %v911_v1 }
 0x8f5   : > { %1269 = vmatmul.mubr.msk.bf16.vlgmr.msra.gmra.mrb[20].mxu1 %vm371_vm3, %v912_v2 }
 0x9c8   : > { %v955_v3 = vpop.f32.mrb[20].mxu1 }
 0x9c9   : > { %v961_v4 = vpack.c.bf16 %v955_v3, %v955_v3  ;;  %v1270_v5 = vpop.f32.mrb[21].mxu1 }
 0x9ca   : > { %v958_v6 = vpop.f32.mrb[22].mxu1 }
 0x9cb   : > { %v1271_v7 = vpop.f32.mrb[23].mxu1  ;;  %1275 = vmatmul.mubr.msk.bf16.vlgmr.msra.gmra.mrb[24].mxu0 %vm371_vm3, %v961_v4 }
 0xa9e   : > { %v1003_v8 = vpop.f32.mrb[24].mxu0 }
 0xa9f   : > { %v1009_v10 = vadd.f32 %v1003_v8, %v849_v59  ;;  %v1276_v12 = vpop.f32.mrb[25].mxu0 }
 0xaa0   : > { %v1006_v14 = vpop.f32.mrb[26].mxu0 }
 0xaa1   : > { %v1017_v15 = vadd.f32 %v1166_v9, %v1009_v10  ;;  %v1277_v16 = vpop.f32.mrb[27].mxu0 }
 0xaa3   : > { %1019 = vst.msk [vmem:[%s282_s24] sm:$0xff] %vm312_vm1, %v1017_v15 }
 0xaa4   : > { %1495 = shalt.err (!%p1492_p11)
}
 0xaa5   : > { %s1496_s13 = scalar_lea.hbm %s1918_s15, 128  ;;  %s1500_s26 = scalar_lea.hbm %s1973_s5, 256 }
 0xaa6   : > { %p1497_p0 = scmp.ne.s32.totalorder %s1918_s15, %s1496_s13  ;;  %p1501_p6 = scmp.lt.u32.totalorder %s1918_s15, %s1973_s5 }
 0xaa7   : > { %p1502_p7 = scmp.lt.u32.totalorder %s1500_s26, %s1496_s13  ;;  %p1504_p8 = scmp.lt.u32.totalorder %s1496_s13, %s1918_s15 }
 0xaa8   : > { %p1498_p4 = pnand %p1497_p0, %p1988_p2 }
 0xaa9   : > { %p1503_p12 = por %p1502_p7, %p1501_p6 }
 0xaaa   : > { %p1499_p13 = pneg %p1498_p4 }
 0xaab   : > { %p1505_p1 = por %p1504_p8, %p1503_p12 }
 0xaad   : > { %p1506_p10 = pnand %p1505_p1, %p1499_p13 }
 0xaaf   : > { %1509 = shalt.err (!%p1506_p10)
}
 0xab0   : > { %1288 = dma.vmem_to_hbm [thread:$0]  (%p1988_p2), %s1920_s7, 128, %s1918_s15, %s1021_s21  }
 0xab1 PF: > { %s1047_s24 = sand.u32 1, %s1548_s18   ;;  %p1989_p3 = scmp.ne.s32.totalorder %s1981_s29, 0 }
 0xab2   : > { %p1990_p5 = scmp.ge.s32.totalorder %s1568_s23, 2  ;;  %s1048_s9 = scalar_lea.sflag [#allocation5], %s1047_s24 }
 0xab4   : > { %p1302_p9 = pnand %p1990_p5, %p1989_p3 }
 0xab6   : > { %1543 = dma.done.wait (!%p1302_p9), %s1048_s9, 128  }
 0xab7   : > { %1545 = vsyncadd (!%p1302_p9), %s1048_s9, 4294967168  ;;  %s22_s23 = sadd.s32 1, %s1568_s23   ;;  %s1991_s18 = smov %s1552_s19 }
 0xab8   : > { %p19_p11 = scmp.ge.s32.totalorder %s22_s23, 4   ;;  %s1992_s19 = smov %s1556_s20 }
 0xab9   : > { %s1993_s20 = smov %s1761_s6  ;;  %s1994_s21 = smov %s1564_s22 }
 0xaba   : > { %s1995_s22 = smov %s1997_s12  ;;  %21 = sbr.rel (!%p19_p11) target bundleno = 7 (0x7), region = 98 }
 0xac1   :  { %1053 = vsyncpa [#allocation4], 1 }
 0xac2   :  { %1055 = vsyncpa [#allocation4 + $0x1], 1 }
 0xac3   :  { %1056 = vsyncpa [#allocation7], 1 }
 0xac4   :  { %1057 = vsyncpa [#allocation5], 1 }
 0xac5   :  { %1059 = vsyncpa [#allocation5 + $0x1], 1 }

</bundles_post_ra>
